<compile_context>
chip_gen: v7x
topology: tpu7x:2x2x1
jax: 0.10.0
libtpu: 0.0.40
codegen_flags: <defaults>
</compile_context>

<pallas_src>
import functools

import jax
import jax.numpy as jnp
from jax.experimental import pallas as pl
from jax.experimental.pallas import tpu as pltpu


def _round_up(x, m):
    return (x + m - 1) // m * m


def _conv_bn_relu_kernel(x0_ref, x1_ref, w_ref, b_ref, o_ref, *,
                         shifts, block_m, pack_k):
    # x0_ref: (tm, Cin)        bf16  rows [i*tm, (i+1)*tm) of flattened padded input
    # x1_ref: (halo_blk, Cin)  bf16  rows [(i+1)*tm, (i+1)*tm + halo_blk)  (halo only)
    # w_ref : pack_k -> (KH*KW*Cin, Cout_p) bf16 (BN-scale folded)
    #         else   -> (KH*KW, Cin, Cout_p) bf16
    # b_ref : (1, Cout_p) f32   folded BN bias
    # o_ref : (tm, Cout_p) bf16 lane-dense output tile
    #
    # Upcast to f32 for the sublane-offset window slicing (avoids packed-bf16
    # relayout), cast back to bf16 right before the MXU.
    x0 = x0_ref[...].astype(jnp.float32)
    x1 = x1_ref[...].astype(jnp.float32)
    xx = jnp.concatenate([x0, x1], axis=0)          # (tm + halo_blk, Cin)

    if pack_k:
        # Pack the KH*KW taps along K -> one big-K matmul; accumulation stays
        # inside the MXU (no tm x Cout_p f32 add chain through VMEM).
        lhs = jnp.concatenate([xx[s:s + block_m, :] for s in shifts], axis=-1)
        lhs = lhs.astype(jnp.bfloat16)              # (tm, KH*KW*Cin)
        acc = jnp.dot(lhs, w_ref[...], preferred_element_type=jnp.float32)
    else:
        # Tiny-Cin stem path: per-tap small-K matmuls (statically unrolled).
        acc = None
        for t, s in enumerate(shifts):
            lhs = xx[s:s + block_m, :].astype(jnp.bfloat16)
            part = jnp.dot(lhs, w_ref[t], preferred_element_type=jnp.float32)
            acc = part if acc is None else acc + part

    y = jnp.maximum(acc + b_ref[...], 0.0)          # fused BN bias + ReLU
    o_ref[...] = y.astype(o_ref.dtype)


def basic_conv2d(x_nchw, weight, gamma, beta, running_mean, running_var,
                 *, padding=1, eps=1e-3, tm=512):
    """x_nchw: (N, Cin, H, W); weight: (Cout, Cin, KH, KW) (PyTorch layouts)."""
    N, Cin, H, W = x_nchw.shape
    Cout, _, KH, KW = weight.shape
    Hp, Wp = H + 2 * padding, W + 2 * padding
    Ho, Wo = Hp - KH + 1, Wp - KW + 1
    Cout_p = _round_up(Cout, 128)                   # lane-dense output columns

    # tap shifts on the flattened padded-spatial index (dh-major, dw-minor)
    shifts = tuple(dh * Wp + dw for dh in range(KH) for dw in range(KW))
    halo_blk = _round_up(max(shifts[-1], 8), 64)    # small halo block, 64-aligned

    M = N * Hp * Wp
    # adaptive tile: aim for >= ~4 grid steps (2 per v7x TensorCore) and keep
    # tm a multiple of halo_blk so the halo block index is exact.
    tm = min(tm, _round_up(pl.cdiv(M, 4), halo_blk))
    tm = _round_up(max(tm, halo_blk), halo_blk)
    ratio = tm // halo_blk
    G = pl.cdiv(M, tm)
    rows = G * tm + halo_blk                        # room for the last halo block

    pack_k = (Cin % 128 == 0)                       # lane-friendly -> packed-K path

    # ---- activations: NCHW -> NHWC, pad once, flatten to (M, Cin), cast bf16 ----
    x = jnp.transpose(x_nchw, (0, 2, 3, 1))                          # (N, H, W, Cin)
    xp = jnp.pad(x, ((0, 0), (padding, padding), (padding, padding), (0, 0)))
    xf = xp.reshape(M, Cin).astype(jnp.bfloat16)
    xf = jnp.pad(xf, ((0, rows - M), (0, 0)))

    # ---- weights: fold BN scale; (Cout,Cin,KH,KW) -> (KH*KW[, *], Cin, Cout_p) ----
    scale = (gamma / jnp.sqrt(running_var + eps)).astype(jnp.float32)
    bias = (beta - running_mean * scale).astype(jnp.float32)
    w = jnp.transpose(weight, (2, 3, 1, 0)).reshape(KH * KW, Cin, Cout)
    w = w.astype(jnp.float32) * scale[None, None, :]
    w = jnp.pad(w, ((0, 0), (0, 0), (0, Cout_p - Cout)))
    if pack_k:
        w = w.reshape(KH * KW * Cin, Cout_p)        # K order matches the lane concat
    w = w.astype(jnp.bfloat16)
    b = jnp.pad(bias, (0, Cout_p - Cout)).reshape(1, Cout_p)

    kernel = functools.partial(_conv_bn_relu_kernel, shifts=shifts,
                               block_m=tm, pack_k=pack_k)

    flops = 2 * (G * tm) * (KH * KW * Cin) * Cout_p
    bytes_accessed = ((G * tm + G * halo_blk) * Cin * 2   # bf16 activations (+halo)
                      + int(w.size) * 2                   # bf16 folded weights
                      + Cout_p * 4                        # f32 bias
                      + G * tm * Cout_p * 2)              # bf16 output

    if pack_k:
        w_spec = pl.BlockSpec((KH * KW * Cin, Cout_p), lambda i: (0, 0))
    else:
        w_spec = pl.BlockSpec((KH * KW, Cin, Cout_p), lambda i: (0, 0, 0))

    out = pl.pallas_call(
        kernel,
        out_shape=jax.ShapeDtypeStruct((G * tm, Cout_p), jnp.bfloat16),
        grid_spec=pltpu.PrefetchScalarGridSpec(
            num_scalar_prefetch=0,
            grid=(G,),
            in_specs=[
                pl.BlockSpec((tm, Cin), lambda i: (i, 0)),                    # rows
                pl.BlockSpec((halo_blk, Cin), lambda i: ((i + 1) * ratio, 0)),  # halo
                w_spec,
                pl.BlockSpec((1, Cout_p), lambda i: (0, 0)),
            ],
            out_specs=pl.BlockSpec((tm, Cout_p), lambda i: (i, 0)),
        ),
        compiler_params=pltpu.CompilerParams(
            dimension_semantics=("parallel",),      # shard grid steps across cores
            vmem_limit_bytes=32 * 1024 * 1024,      # within v7x's 64 MiB budget
        ),
        cost_estimate=pl.CostEstimate(
            flops=flops, transcendentals=0, bytes_accessed=bytes_accessed),
    )(xf, xf, w, b)

    # drop row padding, Cout padding, and the spatial padding rows/cols
    out = out[:M].reshape(N, Hp, Wp, Cout_p)[:, :Ho, :Wo, :Cout]
    return jnp.transpose(out, (0, 3, 1, 2)).astype(x_nchw.dtype)   # NCHW, orig dtype


def _reference(x_nchw, weight, gamma, beta, running_mean, running_var,
               *, padding=1, eps=1e-3):
    y = jax.lax.conv_general_dilated(
        x_nchw.astype(jnp.float32), weight.astype(jnp.float32),
        window_strides=(1, 1), padding=[(padding, padding), (padding, padding)],
        dimension_numbers=("NCHW", "OIHW", "NCHW"))
    scale = gamma / jnp.sqrt(running_var + eps)
    bias = beta - running_mean * scale
    y = y * scale[None, :, None, None] + bias[None, :, None, None]
    return jnp.maximum(y, 0.0)


if __name__ == "__main__":
    key = jax.random.PRNGKey(0)

    def make_inputs(k, N, Cin, H, W, Cout, KH=3, KW=3, wscale=0.1):
        k_x, k_w, k_g, k_b, k_m, k_v = jax.random.split(k, 6)
        x = jax.random.normal(k_x, (N, Cin, H, W), dtype=jnp.float32)
        weight = jax.random.normal(k_w, (Cout, Cin, KH, KW), dtype=jnp.float32) * wscale
        gamma = 1.0 + 0.1 * jax.random.normal(k_g, (Cout,), dtype=jnp.float32)
        beta = 0.1 * jax.random.normal(k_b, (Cout,), dtype=jnp.float32)
        rmean = 0.1 * jax.random.normal(k_m, (Cout,), dtype=jnp.float32)
        rvar = jnp.abs(1.0 + 0.1 * jax.random.normal(k_v, (Cout,), dtype=jnp.float32))
        return x, weight, gamma, beta, rmean, rvar

    def check(args, tol=4e-2):
        out = jax.block_until_ready(basic_conv2d(*args))
        ref = _reference(*args)
        assert out.shape == ref.shape, (out.shape, ref.shape)
        # bf16 MXU operands + bf16 output (f32 accumulation) -> loosened tolerance
        err = float(jnp.max(jnp.abs(out - ref)))
        ref_scale = max(1.0, float(jnp.max(jnp.abs(ref))))
        assert err / ref_scale < tol, (err, ref_scale)

    k1, k2 = jax.random.split(key)
    # 1) Inception-stem-like layer (tiny Cin) -> per-tap MXU path.
    check(make_inputs(k1, N=2, Cin=4, H=16, W=16, Cout=8))
    # 2) deeper Inception-like layer (lane-friendly Cin) -> packed-K single-matmul path.
    check(make_inputs(k2, N=1, Cin=128, H=8, W=8, Cout=64))

    print("KERNEL_OK")
</pallas_src>

<mosaic_0001>
module attributes {stable_mosaic.version = 11 : i64} {
  func.func @_conv_bn_relu_kernel(%arg0: i32, %arg1: memref<192x4xbf16, #tpu.memory_space<vmem>>, %arg2: memref<64x4xbf16, #tpu.memory_space<vmem>>, %arg3: memref<9x4x128xbf16, #tpu.memory_space<vmem>>, %arg4: memref<1x128xf32, #tpu.memory_space<vmem>>, %arg5: memref<192x128xbf16, #tpu.memory_space<vmem>>) attributes {dimension_semantics = [#tpu.dimension_semantics<parallel>], iteration_bounds = array<i64: 4>, scalar_prefetch = 0 : i64, scratch_operands = 0 : i64, tpu.core_type = #tpu.core_type<tc>, window_params = [{transform_indices = @transform_0, window_bounds = array<i64: 192, 4>}, {transform_indices = @transform_1, window_bounds = array<i64: 64, 4>}, {pipeline_mode = #tpu.pipeline_mode<synchronous>, transform_indices = @transform_2, window_bounds = array<i64: 9, 4, 128>}, {pipeline_mode = #tpu.pipeline_mode<synchronous>, transform_indices = @transform_3, window_bounds = array<i64: 1, 128>}, {transform_indices = @transform_4, window_bounds = array<i64: 192, 128>}]} {
    %c0 = arith.constant 0 : index
    %c0_0 = arith.constant 0 : index
    %0 = vector.load %arg1[%c0, %c0_0] : memref<192x4xbf16, #tpu.memory_space<vmem>>, vector<192x4xbf16>
    %1 = arith.extf %0 : vector<192x4xbf16> to vector<192x4xf32>
    %c0_1 = arith.constant 0 : index
    %c0_2 = arith.constant 0 : index
    %2 = vector.load %arg2[%c0_1, %c0_2] : memref<64x4xbf16, #tpu.memory_space<vmem>>, vector<64x4xbf16>
    %3 = arith.extf %2 : vector<64x4xbf16> to vector<64x4xf32>
    %4 = tpu.concatenate %1, %3 in 0 : vector<192x4xf32>, vector<64x4xf32> -> vector<256x4xf32>
    %5 = vector.extract_strided_slice %4 {offsets = [0, 0], sizes = [192, 4], strides = [1, 1]} : vector<256x4xf32> to vector<192x4xf32>
    %6 = arith.truncf %5 : vector<192x4xf32> to vector<192x4xbf16>
    %c0_3 = arith.constant 0 : index
    %c0_4 = arith.constant 0 : index
    %c0_5 = arith.constant 0 : index
    %7 = vector.load %arg3[%c0_3, %c0_4, %c0_5] : memref<9x4x128xbf16, #tpu.memory_space<vmem>>, vector<1x4x128xbf16>
    %8 = vector.shape_cast %7 : vector<1x4x128xbf16> to vector<4x128xbf16>
    %cst = arith.constant dense<0.000000e+00> : vector<192x128xf32>
    %9 = tpu.matmul %6, %8, %cst {dimension_numbers = #tpu.dot_dimension_numbers<[1], [0], [0], [1], [0, 0, 1, 1], [], []>} : vector<192x4xbf16>, vector<4x128xbf16>, vector<192x128xf32> -> vector<192x128xf32>
    %10 = vector.extract_strided_slice %4 {offsets = [1, 0], sizes = [192, 4], strides = [1, 1]} : vector<256x4xf32> to vector<192x4xf32>
    %11 = arith.truncf %10 : vector<192x4xf32> to vector<192x4xbf16>
    %c1 = arith.constant 1 : index
    %c0_6 = arith.constant 0 : index
    %c0_7 = arith.constant 0 : index
    %12 = vector.load %arg3[%c1, %c0_6, %c0_7] : memref<9x4x128xbf16, #tpu.memory_space<vmem>>, vector<1x4x128xbf16>
    %13 = vector.shape_cast %12 : vector<1x4x128xbf16> to vector<4x128xbf16>
    %cst_8 = arith.constant dense<0.000000e+00> : vector<192x128xf32>
    %14 = tpu.matmul %11, %13, %cst_8 {dimension_numbers = #tpu.dot_dimension_numbers<[1], [0], [0], [1], [0, 0, 1, 1], [], []>} : vector<192x4xbf16>, vector<4x128xbf16>, vector<192x128xf32> -> vector<192x128xf32>
    %15 = arith.addf %9, %14 : vector<192x128xf32>
    %16 = vector.extract_strided_slice %4 {offsets = [2, 0], sizes = [192, 4], strides = [1, 1]} : vector<256x4xf32> to vector<192x4xf32>
    %17 = arith.truncf %16 : vector<192x4xf32> to vector<192x4xbf16>
    %c2 = arith.constant 2 : index
    %c0_9 = arith.constant 0 : index
    %c0_10 = arith.constant 0 : index
    %18 = vector.load %arg3[%c2, %c0_9, %c0_10] : memref<9x4x128xbf16, #tpu.memory_space<vmem>>, vector<1x4x128xbf16>
    %19 = vector.shape_cast %18 : vector<1x4x128xbf16> to vector<4x128xbf16>
    %cst_11 = arith.constant dense<0.000000e+00> : vector<192x128xf32>
    %20 = tpu.matmul %17, %19, %cst_11 {dimension_numbers = #tpu.dot_dimension_numbers<[1], [0], [0], [1], [0, 0, 1, 1], [], []>} : vector<192x4xbf16>, vector<4x128xbf16>, vector<192x128xf32> -> vector<192x128xf32>
    %21 = arith.addf %15, %20 : vector<192x128xf32>
    %22 = vector.extract_strided_slice %4 {offsets = [18, 0], sizes = [192, 4], strides = [1, 1]} : vector<256x4xf32> to vector<192x4xf32>
    %23 = arith.truncf %22 : vector<192x4xf32> to vector<192x4xbf16>
    %c3 = arith.constant 3 : index
    %c0_12 = arith.constant 0 : index
    %c0_13 = arith.constant 0 : index
    %24 = vector.load %arg3[%c3, %c0_12, %c0_13] : memref<9x4x128xbf16, #tpu.memory_space<vmem>>, vector<1x4x128xbf16>
    %25 = vector.shape_cast %24 : vector<1x4x128xbf16> to vector<4x128xbf16>
    %cst_14 = arith.constant dense<0.000000e+00> : vector<192x128xf32>
    %26 = tpu.matmul %23, %25, %cst_14 {dimension_numbers = #tpu.dot_dimension_numbers<[1], [0], [0], [1], [0, 0, 1, 1], [], []>} : vector<192x4xbf16>, vector<4x128xbf16>, vector<192x128xf32> -> vector<192x128xf32>
    %27 = arith.addf %21, %26 : vector<192x128xf32>
    %28 = vector.extract_strided_slice %4 {offsets = [19, 0], sizes = [192, 4], strides = [1, 1]} : vector<256x4xf32> to vector<192x4xf32>
    %29 = arith.truncf %28 : vector<192x4xf32> to vector<192x4xbf16>
    %c4 = arith.constant 4 : index
    %c0_15 = arith.constant 0 : index
    %c0_16 = arith.constant 0 : index
    %30 = vector.load %arg3[%c4, %c0_15, %c0_16] : memref<9x4x128xbf16, #tpu.memory_space<vmem>>, vector<1x4x128xbf16>
    %31 = vector.shape_cast %30 : vector<1x4x128xbf16> to vector<4x128xbf16>
    %cst_17 = arith.constant dense<0.000000e+00> : vector<192x128xf32>
    %32 = tpu.matmul %29, %31, %cst_17 {dimension_numbers = #tpu.dot_dimension_numbers<[1], [0], [0], [1], [0, 0, 1, 1], [], []>} : vector<192x4xbf16>, vector<4x128xbf16>, vector<192x128xf32> -> vector<192x128xf32>
    %33 = arith.addf %27, %32 : vector<192x128xf32>
    %34 = vector.extract_strided_slice %4 {offsets = [20, 0], sizes = [192, 4], strides = [1, 1]} : vector<256x4xf32> to vector<192x4xf32>
    %35 = arith.truncf %34 : vector<192x4xf32> to vector<192x4xbf16>
    %c5 = arith.constant 5 : index
    %c0_18 = arith.constant 0 : index
    %c0_19 = arith.constant 0 : index
    %36 = vector.load %arg3[%c5, %c0_18, %c0_19] : memref<9x4x128xbf16, #tpu.memory_space<vmem>>, vector<1x4x128xbf16>
    %37 = vector.shape_cast %36 : vector<1x4x128xbf16> to vector<4x128xbf16>
    %cst_20 = arith.constant dense<0.000000e+00> : vector<192x128xf32>
    %38 = tpu.matmul %35, %37, %cst_20 {dimension_numbers = #tpu.dot_dimension_numbers<[1], [0], [0], [1], [0, 0, 1, 1], [], []>} : vector<192x4xbf16>, vector<4x128xbf16>, vector<192x128xf32> -> vector<192x128xf32>
    %39 = arith.addf %33, %38 : vector<192x128xf32>
    %40 = vector.extract_strided_slice %4 {offsets = [36, 0], sizes = [192, 4], strides = [1, 1]} : vector<256x4xf32> to vector<192x4xf32>
    %41 = arith.truncf %40 : vector<192x4xf32> to vector<192x4xbf16>
    %c6 = arith.constant 6 : index
    %c0_21 = arith.constant 0 : index
    %c0_22 = arith.constant 0 : index
    %42 = vector.load %arg3[%c6, %c0_21, %c0_22] : memref<9x4x128xbf16, #tpu.memory_space<vmem>>, vector<1x4x128xbf16>
    %43 = vector.shape_cast %42 : vector<1x4x128xbf16> to vector<4x128xbf16>
    %cst_23 = arith.constant dense<0.000000e+00> : vector<192x128xf32>
    %44 = tpu.matmul %41, %43, %cst_23 {dimension_numbers = #tpu.dot_dimension_numbers<[1], [0], [0], [1], [0, 0, 1, 1], [], []>} : vector<192x4xbf16>, vector<4x128xbf16>, vector<192x128xf32> -> vector<192x128xf32>
    %45 = arith.addf %39, %44 : vector<192x128xf32>
    %46 = vector.extract_strided_slice %4 {offsets = [37, 0], sizes = [192, 4], strides = [1, 1]} : vector<256x4xf32> to vector<192x4xf32>
    %47 = arith.truncf %46 : vector<192x4xf32> to vector<192x4xbf16>
    %c7 = arith.constant 7 : index
    %c0_24 = arith.constant 0 : index
    %c0_25 = arith.constant 0 : index
    %48 = vector.load %arg3[%c7, %c0_24, %c0_25] : memref<9x4x128xbf16, #tpu.memory_space<vmem>>, vector<1x4x128xbf16>
    %49 = vector.shape_cast %48 : vector<1x4x128xbf16> to vector<4x128xbf16>
    %cst_26 = arith.constant dense<0.000000e+00> : vector<192x128xf32>
    %50 = tpu.matmul %47, %49, %cst_26 {dimension_numbers = #tpu.dot_dimension_numbers<[1], [0], [0], [1], [0, 0, 1, 1], [], []>} : vector<192x4xbf16>, vector<4x128xbf16>, vector<192x128xf32> -> vector<192x128xf32>
    %51 = arith.addf %45, %50 : vector<192x128xf32>
    %52 = vector.extract_strided_slice %4 {offsets = [38, 0], sizes = [192, 4], strides = [1, 1]} : vector<256x4xf32> to vector<192x4xf32>
    %53 = arith.truncf %52 : vector<192x4xf32> to vector<192x4xbf16>
    %c8 = arith.constant 8 : index
    %c0_27 = arith.constant 0 : index
    %c0_28 = arith.constant 0 : index
    %54 = vector.load %arg3[%c8, %c0_27, %c0_28] : memref<9x4x128xbf16, #tpu.memory_space<vmem>>, vector<1x4x128xbf16>
    %55 = vector.shape_cast %54 : vector<1x4x128xbf16> to vector<4x128xbf16>
    %cst_29 = arith.constant dense<0.000000e+00> : vector<192x128xf32>
    %56 = tpu.matmul %53, %55, %cst_29 {dimension_numbers = #tpu.dot_dimension_numbers<[1], [0], [0], [1], [0, 0, 1, 1], [], []>} : vector<192x4xbf16>, vector<4x128xbf16>, vector<192x128xf32> -> vector<192x128xf32>
    %57 = arith.addf %51, %56 : vector<192x128xf32>
    %c0_30 = arith.constant 0 : index
    %c0_31 = arith.constant 0 : index
    %58 = vector.load %arg4[%c0_30, %c0_31] : memref<1x128xf32, #tpu.memory_space<vmem>>, vector<1x128xf32>
    %59 = vector.broadcast %58 : vector<1x128xf32> to vector<192x128xf32>
    %60 = arith.addf %57, %59 : vector<192x128xf32>
    %cst_32 = arith.constant 0.000000e+00 : f32
    %61 = vector.broadcast %cst_32 : f32 to vector<192x128xf32>
    %62 = arith.maximumf %60, %61 : vector<192x128xf32>
    %63 = arith.truncf %62 : vector<192x128xf32> to vector<192x128xbf16>
    %c0_33 = arith.constant 0 : index
    %c0_34 = arith.constant 0 : index
    %64 = vector.load %arg5[%c0_33, %c0_34] : memref<192x128xbf16, #tpu.memory_space<vmem>>, vector<192x128xbf16>
    tpu.vector_store %arg5[%c0_33, %c0_34], %63 {strides = array<i32>} : memref<192x128xbf16, #tpu.memory_space<vmem>>, vector<192x128xbf16>,
    return
  }
  func.func @transform_0(%arg0: i32) -> (i32, i32) {
    %c0_i32 = arith.constant 0 : i32
    %c0_i32_0 = arith.constant 0 : i32
    return %arg0, %c0_i32 : i32, i32
  }
  func.func @transform_1(%arg0: i32) -> (i32, i32) {
    %c1_i32 = arith.constant 1 : i32
    %0 = arith.addi %arg0, %c1_i32 : i32
    %c3_i32 = arith.constant 3 : i32
    %1 = arith.muli %0, %c3_i32 : i32
    %c0_i32 = arith.constant 0 : i32
    %c0_i32_0 = arith.constant 0 : i32
    return %1, %c0_i32 : i32, i32
  }
  func.func @transform_2(%arg0: i32) -> (i32, i32, i32) {
    %c0_i32 = arith.constant 0 : i32
    %c0_i32_0 = arith.constant 0 : i32
    %c0_i32_1 = arith.constant 0 : i32
    %c0_i32_2 = arith.constant 0 : i32
    return %c0_i32, %c0_i32_0, %c0_i32_1 : i32, i32, i32
  }
  func.func @transform_3(%arg0: i32) -> (i32, i32) {
    %c0_i32 = arith.constant 0 : i32
    %c0_i32_0 = arith.constant 0 : i32
    %c0_i32_1 = arith.constant 0 : i32
    return %c0_i32, %c0_i32_0 : i32, i32
  }
  func.func @transform_4(%arg0: i32) -> (i32, i32) {
    %c0_i32 = arith.constant 0 : i32
    %c0_i32_0 = arith.constant 0 : i32
    return %arg0, %c0_i32 : i32, i32
  }
}

</mosaic_0001>

<bundles_post_ra>
// kernel: tpu_custom_call.1
= control target key start
LH: loop header
LB: loop body
LE: loop exit
PB: predicated region body
PF: predicated region fallthrough
CT: control target
= control target key end

     0   :  { %9 = vsyncpa [#allocation3], 0  ;;  %s4373_s0 = inlined_call_operand.vmem [shape: bf16[832,4], index: 0, kind: input, shape index: {}]   ;;  %s4374_s1 = inlined_call_operand.vmem [shape: bf16[832,4], index: 1, kind: input, shape index: {}]   ;;  %s4375_s2 = inlined_call_operand.vmem [shape: bf16[9,4,128], index: 2, kind: input, shape index: {}]   ;;  %s4376_s3 = inlined_call_operand.vmem [shape: f32[1,128], index: 3, kind: input, shape index: {}]   ;;  %s4377_s4 = inlined_call_operand.hbm [shape: bf16[768,128], index: 4, kind: output, shape index: {}]  }
   0x1   :  { %11 = vsyncpa [#allocation3 + $0x1], 0  ;;  %s3519_s15 = smov 0   ;;  %s3521_s16 = smov 0  }
   0x2   :  { %s3523_s17 = smov 0   ;;  %s3525_s18 = smov 0  }
   0x3 LB: > { %s3540_s19 = sadd.s32 4294967295, %s3489_s18   ;;  %s2549_s20 = sadd.s32 4294967294, %s3489_s18   ;;  %s3489_s18 = sphi %s3525_s18, %s4415_s18   ;;  %s3485_s17 = sphi %s3523_s17, %s4414_s17   ;;  %s3481_s16 = sphi %s3521_s16, %s4413_s16   ;;  %s3477_s15 = sphi %s3519_s15, %s4412_s15  }
   0x4   : > { %s3544_s21 = sadd.s32 1, %s3489_s18   ;;  %s122_s22 = sadd.s32 1, %s3485_s17 }
   0x5   : > { %s119_s23 = ssub.s32 %s3489_s18, %s3544_s21  ;;  %p132_p0 = scmp.ne.s32.totalorder %s3485_s17, %s3481_s16 }
   0x6   : > { %p120_p1 = scmp.eq.s32.totalorder %s119_s23, 0  ;;  %p133_p2 = scmp.eq.s32.totalorder %s3540_s19, 3 }
   0x7   : > { %p138_p3 = scmp.ne.s32.totalorder %s3481_s16, %s3477_s15  ;;  %p139_p4 = scmp.eq.s32.totalorder %s2549_s20, 3 }
   0x8   : > { %s3555_s24 = scalar_select %p120_p1, %s3485_s17, %s122_s22  }
   0x9   : > { %p3557_p5 = por %p133_p2, %p132_p0  ;;  %p3561_p6 = por %p139_p4, %p138_p3 }
   0xa   : > { %p2552_p7 = scmp.ge.s32.totalorder %s3489_s18, 1  ;;  %p193_p8 = scmp.lt.s32.totalorder %s3489_s18, 5 }
   0xc   : > { %p194_p9 = pnand %p2552_p7, %p193_p8 }
   0xe   : > { %197 = sbr.rel (%p194_p9) target bundleno = 485 (0x1e5), region = 36 }
  0x15   : > { %v2569_v0 = vld [vmem:[%s4375_s2 + $0x2] sm:$0x3]  ;;  %vm468_vm0 = vcmask 1041408   ;;  %v3573_v1 = vld [vmem:[%s4375_s2 + $0x8] sm:$0x3]  ;;  %s230_s5 = smul.u32 24, %s3540_s19 }
  0x16   : > { %3358 = vmatprep.subr.msk.bf16.mxu1 %vm468_vm0, %v2569_v0  ;;  %3362 = vmatprep.subr.msk.bf16.mxu0 %vm468_vm0, %v3573_v1  ;;  %v470_v2 = vsel %vm468_vm0, %v2569_v0, 0  ;;  %v3582_v3 = vsel %vm468_vm0, %v3573_v1, 0  ;;  %v326_v4 = vld [vmem:[%s4375_s2] sm:$0x3]  ;;  %v2635_v5 = vld [vmem:[%s4375_s2 + $0xa] sm:$0x3] }
  0x17   : > { %4389 = vst [vmem:[#allocation5_spill] sm:$0xff] %v3582_v3  ;;  %2931 = vmatpush3.bf16.msra.mxu1 %v470_v2  ;;  %3035 = vmatpush3.bf16.msra.mxu0 %v3582_v3  ;;  %p235_p10 = scmp.lt.s32.totalorder %s230_s5, 103  ;;  %s244_s10 = sadd.s32 1, %s3540_s19  ;;  %vm330_vm1 = vsmask.f32 7424  ;;  %vm431_vm2 = vcmask 31744  }
  0x18   : > { %3359 = vmatprep.subr.msk.bf16.mxu1 %vm468_vm0, %v326_v4  ;;  %3364 = vmatprep.subr.msk.bf16.mxu0 %vm468_vm0, %v2635_v5  ;;  %s3594_s12 = smul.u32 24, %s244_s10  ;;  %vm1164_vm3 = vsmask.f32 6400  ;;  %v626_v8 = vsel %vm468_vm0, %v326_v4, 0  ;;  %v1483_v9 = vsel %vm468_vm0, %v2635_v5, 0  ;;  %vm1420_vm4 = vcmask 1045504  }
  0x19   : > { %s4417_s5 = smov (!%p235_p10, %s230_s5), 103  ;;  %v3647_v36 = vld [vmem:[%s4375_s2 + $0x4] sm:$0x3]  ;;  %v3683_v51 = vld [vmem:[%s4375_s2 + $0xc] sm:$0x3]  ;;  %vm772_vm5 = vcmask 1046528  }
  0x1a   : > { %s2553_s11 = sshll.u32 %s4417_s5, 2  ;;  %p247_p11 = scmp.lt.s32.totalorder %s3594_s12, 103  ;;  %vm1812_vm6 = vsmask.f32 5376  ;;  %vm2068_vm7 = vcmask 1044480  }
  0x1b   : > { %s3599_s20 = scalar_lea.vmem %s4373_s0, %s2553_s11  ;;  %s2741_s27 = smul.u32 1536, %s3540_s19 }
  0x1c   : > { %v3602_v6 = vld [vmem:[%s3599_s20] sm:$0xff]   ;;  %v3605_v7 = vld [vmem:[%s3599_s20 + $0x8] sm:$0xff]   ;;  %v3610_v10 = vld [vmem:[%s3599_s20 + $0x10] sm:$0xff]   ;;  %s4419_s12 = smov (!%p247_p11, %s3594_s12), 103  ;;  %s3491_s7 = smov [#allocation2]  }
  0x1d   : > { %v332_v11 = vshrl.u32 %v3602_v6, 16  ;;  %v334_v12 = vshll.u32 %v3602_v6, 16  ;;  %v339_v13 = vshll.u32 %v3605_v7, 16  ;;  %v343_v14 = vshrl.u32 %v3605_v7, 16  ;;  %v3624_v17 = vld [vmem:[%s3599_s20 + $0x18] sm:$0xff]   ;;  %v3627_v18 = vld [vmem:[%s3599_s20 + $0x20] sm:$0xff]   ;;  %s4324_s5 = scalar_lea.hbm %s4377_s4, %s2741_s27 }
  0x1e   : > { %v3618_v15 = vshll.u32 %v3610_v10, 16  ;;  %v3621_v16 = vshrl.u32 %v3610_v10, 16  ;;  %v3633_v26 = vshll.u32 %v3624_v17, 16  ;;  %v3636_v30 = vshrl.u32 %v3624_v17, 16  ;;  %v3639_v31 = vld [vmem:[%s3599_s20 + $0x28] sm:$0xff]   ;;  %v3656_v41 = vld [vmem:[%s3599_s20 + $0x30] sm:$0xff]  }
  0x1f   : > { %v336_v19 = vrot.slane %v334_v12, 1  ;;  %v341_v20 = vrot.slane %v339_v13, 1  ;;  %v1165_v21 = vrot.slane %v343_v14, 1  ;;  %v1166_v22 = vrot.slane %v339_v13, 2  ;;  %v3678_v50 = vld [vmem:[%s3599_s20 + $0x38] sm:$0xff]   ;;  %s2555_s29 = sshll.u32 %s4419_s12, 2 }
  0x20   : > { %v1168_v23 = vrot.slane %v3621_v16, 1  ;;  %v1169_v24 = vrot.slane %v3618_v15, 2  ;;  %v349_v25 = vrot.slane %v3618_v15, 1  ;;  %v1173_v33 = vrot.slane %v3633_v26, 2  ;;  %v3720_v12 = vld [vmem:[%s3599_s20 + $0x40] sm:$0xff]   ;;  %s3733_s6 = scalar_lea.vmem %s4374_s1, %s2555_s29  ;;  %s3431_s8 = sshll.u32 %s3491_s7, 4  ;;  %s3432_s8 = int_to_ptr.vmem [resolvable:$false] %s3431_s8 }
  0x21   : > { %v337_v27 = vor.u32 %v336_v19, %v332_v11  ;;  %v345_v28 = vor.u32 %v343_v14, %v341_v20  ;;  %v1167_v29 = vor.u32 %v1166_v22, %v1165_v21  ;;  %v357_v35 = vrot.slane %v3633_v26, 1  ;;  %v3728_v21 = vld [vmem:[%s3599_s20 + $0x48] sm:$0xff]   ;;  %s3433_s9 = scalar_lea.vmem %s3432_s8, 3072 }
  0x22   : > { %v1170_v32 = vor.u32 %v1169_v24, %v1168_v23  ;;  %v353_v34 = vor.u32 %v3621_v16, %v349_v25  ;;  %v1172_v39 = vrot.slane %v3636_v30, 1  ;;  %v3653_v40 = vshll.u32 %v3627_v18, 16 }
  0x23   : > { %v342_v37 = vsel %vm330_vm1, %v337_v27, %v341_v20  ;;  %v350_v38 = vsel %vm330_vm1, %v345_v28, %v349_v25  ;;  %v3662_v44 = vshrl.u32 %v3627_v18, 16  ;;  %v361_v45 = vor.u32 %v3636_v30, %v357_v35  ;;  %v3745_v28 = vld [vmem:[%s3599_s20 + $0x50] sm:$0xff]  }
  0x24   : > { %2932 = vmatprep.mubr.msk.bf16.mxu1 %vm431_vm2, %v342_v37  ;;  %v1171_v42 = vsel %vm1164_vm3, %v1167_v29, %v1170_v32  ;;  %v358_v43 = vsel %vm330_vm1, %v353_v34, %v357_v35  ;;  %v1174_v46 = vor.u32 %v1173_v33, %v1172_v39  ;;  %v1177_v47 = vrot.slane %v3653_v40, 2 }
  0x25   : > { %3036 = vmatprep.mubr.msk.bf16.mxu0 %vm431_vm2, %v1171_v42  ;;  %2933 = vmatmul.mubr.msk.bf16.vlgmr.msra.gmra.mrb[0].mxu1 %vm431_vm2, %v350_v38  ;;  %v365_v48 = vrot.slane %v3653_v40, 1  ;;  %v3675_v49 = vshll.u32 %v3639_v31, 16  ;;  %v1176_v52 = vrot.slane %v3662_v44, 1  ;;  %v3688_v53 = vshrl.u32 %v3639_v31, 16  ;;  %v3760_v38 = vld [vmem:[%s3599_s20 + $0x58] sm:$0xff]   ;;  %s227_s20 = sand.u32 1, %s3481_s16  }
  0x26   : > { %2957 = vmatpush3.bf16.msra.mxu1 %v626_v8  ;;  %2936 = vmatprep.mubr.msk.bf16.mxu1 %vm431_vm2, %v358_v43  ;;  %v3691_v54 = vshll.u32 %v3656_v41, 16  ;;  %v3694_v55 = vshrl.u32 %v3656_v41, 16  ;;  %v1175_v56 = vsel %vm1164_vm3, %v1170_v32, %v1174_v46  ;;  %v3707_v0 = vshll.u32 %v3678_v50, 16  ;;  %s3368_s22 = smul.u32 96, %s227_s20  ;;  %s4332_s19 = scalar_lea.sflag [#allocation3], %s227_s20 }
  0x27   : > { %v1181_v57 = vrot.slane %v3675_v49, 2  ;;  %v369_v58 = vor.u32 %v3662_v44, %v365_v48  ;;  %3360 = vmatprep.subr.msk.bf16.mxu1 %vm468_vm0, %v3647_v36  ;;  %3037 = vmatmul.mubr.msk.bf16.vlgmr.msra.gmra.mrb[0].mxu0 %vm431_vm2, %v1175_v56  ;;  %v1178_v59 = vor.u32 %v1177_v47, %v1176_v52  ;;  %v1180_v60 = vrot.slane %v3688_v53, 1 }
  0x28   : > { %v373_v61 = vrot.slane %v3675_v49, 1  ;;  %v1184_v62 = vrot.slane %v3694_v55, 1  ;;  %3061 = vmatpush3.bf16.msra.mxu0 %v1483_v9  ;;  %v1185_v63 = vrot.slane %v3691_v54, 2  ;;  %v3710_v2 = vshrl.u32 %v3678_v50, 16  ;;  %s4287_s23 = scalar_lea.vmem [#allocation2], %s3368_s22 }
  0x29   : > { %v1179_v4 = vsel %vm1164_vm3, %v1174_v46, %v1178_v59  ;;  %v366_v5 = vsel %vm330_vm1, %v361_v45, %v365_v48  ;;  %v1182_v8 = vor.u32 %v1181_v57, %v1180_v60  ;;  %3365 = vmatprep.subr.msk.bf16.mxu0 %vm468_vm0, %v3683_v51  ;;  %v381_v14 = vrot.slane %v3691_v54, 1  ;;  %s2475_s28 = sshll.u32 %s4287_s23, 4  ;;  %s4326_s28 = int_to_ptr.vmem [resolvable:$true] %s2475_s28 }
  0x2a   : > { %3040 = vmatprep.mubr.msk.bf16.mxu0 %vm431_vm2, %v1179_v4  ;;  %v374_v9 = vsel %vm330_vm1, %v369_v58, %v373_v61  ;;  %v1186_v11 = vor.u32 %v1185_v63, %v1184_v62  ;;  %v1188_v19 = vrot.slane %v3710_v2, 1  ;;  %v1189_v20 = vrot.slane %v3707_v0, 2  ;;  %v305_v63 = vld [vmem:[%s3733_s6 + $0x4] sm:$0xf]  ;;  %p3434_p1 = scmp.lt.s32.totalorder %s4326_s28, %s3432_s8 }
  0x2b   : > { %v1183_v13 = vsel %vm1164_vm3, %v1178_v59, %v1182_v8  ;;  %v377_v23 = vor.u32 %v3688_v53, %v373_v61  ;;  %v385_v24 = vor.u32 %v3694_v55, %v381_v14  ;;  %v389_v25 = vrot.slane %v3707_v0, 1 }
  0x2c   : > { %v1187_v22 = vsel %vm1164_vm3, %v1182_v8, %v1186_v11  ;;  %v3741_v27 = vshll.u32 %v3720_v12, 16  ;;  %v3748_v29 = vor.u32 %v1189_v20, %v1188_v19  ;;  %v3751_v32 = vshrl.u32 %v3720_v12, 16  ;;  %v307_v20 = vld [vmem:[%s3733_s6 + $0xc] sm:$0xf] }
  0x2d   : > { %2937 = vmatmul.mubr.msk.bf16.gmra.mrb[4].mxu1 %vm431_vm2, %v366_v5  ;;  %v3754_v33 = vshll.u32 %v3728_v21, 16  ;;  %v382_v34 = vsel %vm330_vm1, %v377_v23, %v381_v14  ;;  %v1421_v35 = vrot.slane %v3605_v7, 2  ;;  %v1422_v37 = vrot.slane %v3610_v10, 2  ;;  %v304_v14 = vld [vmem:[%s3733_s6] sm:$0xf] }
  0x2e   : > { %2940 = vmatprep.mubr.msk.bf16.mxu1 %vm431_vm2, %v374_v9  ;;  %v390_v39 = vsel %vm330_vm1, %v385_v24, %v389_v25  ;;  %v397_v42 = vrot.slane %v3741_v27, 1  ;;  %v1424_v43 = vrot.slane %v3624_v17, 2  ;;  %v393_v45 = vor.u32 %v3710_v2, %v389_v25 }
  0x2f   : > { %3041 = vmatmul.mubr.msk.bf16.gmra.mrb[4].mxu0 %vm431_vm2, %v1183_v13  ;;  %v4378_v46 = vrot.slane %v3627_v18, 2  ;;  %v3768_v47 = vshll.u32 %v3745_v28, 16  ;;  %v1191_v48 = vsel %vm1164_vm3, %v1186_v11, %v3748_v29  ;;  %v405_v56 = vrot.slane %v3754_v33, 1 }
  0x30   : > { %3044 = vmatprep.mubr.msk.bf16.mxu0 %vm431_vm2, %v1187_v22  ;;  %v401_v52 = vor.u32 %v3751_v32, %v397_v42  ;;  %v3776_v57 = vshrl.u32 %v3728_v21, 16  ;;  %v1423_v58 = vsel %vm1420_vm4, %v1421_v35, %v1422_v37  ;;  %v3781_v59 = vshrl.u32 %v3745_v28, 16  ;;  %v3817_v35 = vld [vmem:[%s3733_s6 + $0x8] sm:$0xf] }
  0x31   : > { %v3784_v60 = vshll.u32 %v3760_v38, 16  ;;  %v3787_v61 = vsel %vm1420_vm4, %v1422_v37, %v1424_v43  ;;  %v1655_v62 = vsel %vm468_vm0, %v3683_v51, 0  ;;  %v398_v4 = vsel %vm330_vm1, %v393_v45, %v397_v42 }
  0x32   : > { %v3797_v5 = vsel %vm1420_vm4, %v1424_v43, %v4378_v46  ;;  %v413_v8 = vrot.slane %v3768_v47, 1  ;;  %v406_v51 = vsel %vm330_vm1, %v401_v52, %v405_v56  ;;  %v409_v11 = vor.u32 %v3776_v57, %v405_v56 }
  0x33   : > { %v773_v19 = vrot.slane %v3602_v6, 1  ;;  %v421_v23 = vrot.slane %v3784_v60, 1  ;;  %v3810_v24 = vcombine.low %v304_v14, %v305_v63  ;;  %v774_v25 = vrot.slane %v3605_v7, 1 }
  0x34   : > { %v417_v22 = vor.u32 %v3781_v59, %v413_v8  ;;  %v776_v37 = vrot.slane %v3610_v10, 1  ;;  %v780_v42 = vrot.slane %v3627_v18, 1  ;;  %v782_v43 = vrot.slane %v3639_v31, 1 }
  0x35   : > { %2941 = vmatmul.mubr.msk.bf16.gmra.mrb[8].mxu1 %vm431_vm2, %v382_v34  ;;  %v3814_v34 = vld [vmem:[%s3733_s6 + $0x10] ss:$0 sps:$4 sm:$0xff]   ;;  %v3823_v45 = vcombine.low %v304_v14, %v304_v14  ;;  %v3829_v52 = vcombine.low %v3817_v35, %v307_v20  ;;  %v4379_v56 = vrot.slane %v3656_v41, 1  ;;  %v1817_v46 = vrot.slane %v3633_v26, 3  ;;  %s3427_s6 = scalar_lea.vmem %s4326_s28, 1536 }
  0x36   : > { %2944 = vmatprep.mubr.msk.bf16.mxu1 %vm431_vm2, %v390_v39  ;;  %v778_v39 = vrot.slane %v3624_v17, 1  ;;  %v3843_v14 = vsel %vm772_vm5, %v780_v42, %v782_v43  ;;  %v1821_v3 = vrot.slane %v3653_v40, 3  ;;  %p3428_p12 = scmp.ne.s32.totalorder %s4326_s28, %s3427_s6  ;;  %p3435_p2 = scmp.lt.s32.totalorder %s3433_s9, %s3427_s6 }
  0x37   : > { %3045 = vmatmul.mubr.msk.bf16.gmra.mrb[8].mxu0 %vm431_vm2, %v1191_v48  ;;  %4390 = vst [vmem:[#allocation6_spill] sm:$0xff] %v3823_v45  ;;  %v3826_v48 = vsel %vm772_vm5, %v773_v19, %v774_v25  ;;  %4391 = vst [vmem:[#allocation7_spill] sm:$0xff] %v3843_v14  ;;  %v3847_v19 = vrot.slane %v3810_v24, 2  ;;  %v1644_v20 = vrot.slane %v3829_v52, 2  ;;  %v4395_v14 = vrot.slane %v3627_v18, 2 }
  0x38   : > { %3062 = vmatprep.mubr.msk.bf16.mxu0 %vm431_vm2, %v1423_v58  ;;  %v3834_v58 = vsel %vm772_vm5, %v774_v25, %v776_v37  ;;  %v3837_v63 = vsel %vm772_vm5, %v776_v37, %v778_v39  ;;  %v3840_v13 = vsel %vm772_vm5, %v778_v39, %v780_v42  ;;  %v1646_v25 = vrot.slane %v3814_v34, 2  ;;  %v3859_v37 = vld [vmem:[%s4375_s2 + $0xe] sm:$0x3]  ;;  %p3429_p13 = pnand %p3428_p12, %p3557_p5  ;;  %p3436_p3 = por %p3435_p2, %p3434_p1 }
  0x39   : > { %v1813_v39 = vrot.slane %v3621_v16, 2  ;;  %v1816_v42 = vrot.slane %v3636_v30, 2  ;;  %v3873_v9 = vsel %vm1420_vm4, %v3847_v19, %v1644_v20  ;;  %v1820_v30 = vrot.slane %v3662_v44, 2 }
  0x3a   : > { %4393 = vst [vmem:[#allocation9_spill] sm:$0xff] %v3873_v9  ;;  %v3876_v16 = vsel %vm1420_vm4, %v1644_v20, %v1646_v25  ;;  %v1828_v25 = vrot.slane %v3694_v55, 2  ;;  %v1432_v55 = vrot.slane %v3678_v50, 2  ;;  %p3430_p0 = pneg %p3429_p13 }
  0x3b   : > { %v1818_v26 = vor.u32 %v1817_v46, %v1816_v42  ;;  %v422_v46 = vsel %vm330_vm1, %v417_v22, %v421_v23  ;;  %v1822_v40 = vor.u32 %v1821_v3, %v1820_v30  ;;  %v1837_v42 = vrot.slane %v3741_v27, 3 }
  0x3c   : > { %p3437_p4 = pnand %p3436_p3, %p3430_p0 }
  0x3d   : > { %2945 = vmatmul.mubr.msk.bf16.gmra.mrb[12].mxu1 %vm431_vm2, %v398_v4  ;;  %v3853_v4 = vsel %vm772_vm5, %v782_v43, %v4379_v56  ;;  %v3868_v43 = vshrl.u32 %v3760_v38, 16  ;;  %v427_v56 = vshll.u32 %v3823_v45, 16  ;;  %v4394_v45 = vrot.slane %v3639_v31, 2 }
  0x3e   : > { %2948 = vmatprep.mubr.msk.bf16.mxu1 %vm431_vm2, %v406_v51  ;;  %4392 = vst [vmem:[#allocation8_spill] sm:$0xff] %v3853_v4  ;;  %v1814_v51 = vrot.slane %v3618_v15, 3  ;;  %v414_v4 = vsel %vm330_vm1, %v409_v11, %v413_v8  ;;  %v1825_v8 = vrot.slane %v3675_v49, 3  ;;  %v3910_v3 = vsel %vm1812_vm6, %v1818_v26, %v1822_v40 }
  0x3f   : > { %3063 = vmatmul.mubr.msk.bf16.vlgmr.msra.gmra.mrb[0].mxu0 %vm431_vm2, %v3787_v61  ;;  %v3888_v9 = vsel %vm1420_vm4, %v4395_v14, %v4394_v45  ;;  %v425_v11 = vor.u32 %v3868_v43, %v421_v23  ;;  %v429_v20 = vrot.slane %v427_v56, 1  ;;  %v1829_v45 = vrot.slane %v3691_v54, 3 }
  0x40   : > { %3087 = vmatpush3.bf16.msra.mxu0 %v1655_v62  ;;  %3066 = vmatprep.mubr.msk.bf16.mxu0 %vm431_vm2, %v3797_v5  ;;  %v1815_v15 = vor.u32 %v1814_v51, %v1813_v39  ;;  %v1824_v62 = vrot.slane %v3688_v53, 2  ;;  %v4396_v14 = vrot.slane %v3656_v41, 2  ;;  %v4397_v53 = vrot.slane %v3639_v31, 2 }
  0x41   : > { %3366 = vmatprep.subr.msk.bf16.mxu0 %vm468_vm0, %v3859_v37  ;;  %v1832_v23 = vrot.slane %v3710_v2, 2  ;;  %v1434_v54 = vrot.slane %v3720_v12, 2  ;;  %v1830_v56 = vor.u32 %v1829_v45, %v1828_v25  ;;  %v1836_v51 = vrot.slane %v3751_v32, 2 }
  0x42   : > { %v3895_v44 = vsel %vm1812_vm6, %v1815_v15, %v1818_v26  ;;  %v3907_v22 = vsel %vm1420_vm4, %v4397_v53, %v4396_v14  ;;  %v1826_v49 = vor.u32 %v1825_v8, %v1824_v62  ;;  %v1840_v15 = vrot.slane %v3776_v57, 2 }
  0x43   : > { %v430_v2 = vsel %vm330_vm1, %v425_v11, %v429_v20  ;;  %v1838_v62 = vor.u32 %v1837_v42, %v1836_v51  ;;  %v1848_v8 = vrot.slane %v3868_v43, 2  ;;  %v1849_v20 = vrot.slane %v3784_v60, 3 }
  0x44   : > { %v3918_v39 = vsel %vm1812_vm6, %v1822_v40, %v1826_v49  ;;  %v3927_v26 = vsel %vm1812_vm6, %v1826_v49, %v1830_v56  ;;  %v1845_v40 = vrot.slane %v3768_v47, 3  ;;  %v4385_v45 = vshrl.u32 %v3810_v24, 16 }
  0x45   : > { %2949 = vmatmul.mubr.msk.bf16.gmra.mrb[16].mxu1 %vm431_vm2, %v414_v4  ;;  %v1833_v4 = vrot.slane %v3707_v0, 3  ;;  %v1841_v0 = vrot.slane %v3754_v33, 3  ;;  %v4384_v49 = vshll.u32 %v3810_v24, 16  ;;  %v1850_v51 = vor.u32 %v1849_v20, %v1848_v8 }
  0x46   : > { %2952 = vmatprep.mubr.msk.bf16.mxu1 %vm431_vm2, %v422_v46  ;;  %v1844_v46 = vrot.slane %v3781_v59, 2  ;;  %v1860_v42 = vshll.u32 %v3829_v52, 16 }
  0x47   : > { %3067 = vmatmul.mubr.msk.bf16.gmra.mrb[4].mxu0 %vm431_vm2, %v3888_v9  ;;  %v1834_v30 = vor.u32 %v1833_v4, %v1832_v23  ;;  %v1842_v11 = vor.u32 %v1841_v0, %v1840_v15  ;;  %v1857_v23 = vshrl.u32 %v3829_v52, 16  ;;  %v4398_v15 = vrot.slane %v3656_v41, 2 }
  0x48   : > { %3070 = vmatprep.mubr.msk.bf16.mxu0 %vm431_vm2, %v3907_v22  ;;  %v1846_v53 = vor.u32 %v1845_v40, %v1844_v46  ;;  %v3965_v40 = vsel %vm1420_vm4, %v1432_v55, %v1434_v54  ;;  %v1862_v8 = vrot.slane %v1860_v42, 3 }
  0x49   : > { %v3936_v25 = vsel %vm1812_vm6, %v1830_v56, %v1834_v30  ;;  %v3941_v14 = vsel %vm1812_vm6, %v1834_v30, %v1838_v62  ;;  %v3946_v4 = vsel %vm1812_vm6, %v1838_v62, %v1842_v11  ;;  %v1852_v56 = vrot.slane %v4385_v45, 2 }
  0x4a   : > { %v3955_v30 = vsel %vm1420_vm4, %v4398_v15, %v1432_v55  ;;  %v3958_v0 = vsel %vm1812_vm6, %v1842_v11, %v1846_v53  ;;  %v1853_v62 = vrot.slane %v4384_v49, 3  ;;  %v1859_v46 = vrot.slane %v1857_v23, 2 }
  0x4b   : > { %v2069_v15 = vrot.slane %v3610_v10, 3  ;;  %v2070_v11 = vrot.slane %v3624_v17, 3  ;;  %v2074_v55 = vrot.slane %v3639_v31, 3  ;;  %v835_v45 = vsel %vm468_vm0, %v3647_v36, 0 }
  0x4c   : > { %v1854_v20 = vor.u32 %v1853_v62, %v1852_v56  ;;  %v3974_v23 = vor.u32 %v1862_v8, %v1859_v46  ;;  %v1438_v62 = vrot.slane %v3745_v28, 2  ;;  %v2608_v36 = vcombine.low %v3817_v35, %v3817_v35 }
  0x4d   : > { %2953 = vmatmul.mubr.msk.bf16.gmra.mrb[20].mxu1 %vm431_vm2, %v430_v2  ;;  %v3968_v2 = vsel %vm1812_vm6, %v1846_v53, %v1850_v51  ;;  %v1436_v53 = vrot.slane %v3728_v21, 2  ;;  %v3985_v42 = vsel %vm2068_vm7, %v2069_v15, %v2070_v11  ;;  %v4386_v15 = vrot.slane %v3656_v41, 3 }
  0x4e   : > { %2958 = vmatprep.mubr.msk.bf16.mxu1 %vm431_vm2, %v3602_v6  ;;  %v2072_v6 = vrot.slane %v3627_v18, 3  ;;  %v3982_v56 = vsel %vm1812_vm6, %v1850_v51, %v1854_v20  ;;  %v3990_v46 = vsel %vm1812_vm6, %v1854_v20, %v3974_v23  ;;  %v4003_v51 = vld [vmem:[%s4375_s2 + $0x6] sm:$0x3]  ;;  %v1440_v35 = vrot.slane %v3760_v38, 2 }
  0x4f   : > { %3071 = vmatmul.mubr.msk.bf16.gmra.mrb[8].mxu0 %vm431_vm2, %v3955_v30  ;;  %v4008_v20 = vsel %vm1420_vm4, %v1434_v54, %v1436_v53  ;;  %v4028_v54 = vrot.slane %v3760_v38, 1 }
  0x50   : > { %3074 = vmatprep.mubr.msk.bf16.mxu0 %vm431_vm2, %v3965_v40  ;;  %v3993_v8 = vsel %vm2068_vm7, %v2070_v11, %v2072_v6  ;;  %v3996_v49 = vsel %vm2068_vm7, %v2072_v6, %v2074_v55  ;;  %v4014_v11 = vsel %vm1420_vm4, %v1436_v53, %v1438_v62  ;;  %v4044_v53 = vsel %vm1420_vm4, %v1438_v62, %v1440_v35 }
  0x51   : > { %v1196_v62 = vrot.slane %v3776_v57, 1  ;;  %v1201_v57 = vrot.slane %v3768_v47, 2  ;;  %v1911_v47 = vsel %vm468_vm0, %v3859_v37, 0  ;;  %v2090_v37 = vrot.slane %v3829_v52, 3 }
  0x55   : > { %2959 = vmatmul.mubr.msk.bf16.vlgmr.msra.gmra.mrb[0].mxu1 %vm431_vm2, %v3605_v7  ;;  %v4023_v7 = vsel %vm2068_vm7, %v2074_v55, %v4386_v15  ;;  %v4050_v15 = vsel %vm1420_vm4, %v1440_v35, %v3847_v19 }
  0x56   : > { %2983 = vmatpush3.bf16.msra.mxu1 %v835_v45  ;;  %2962 = vmatprep.mubr.msk.bf16.mxu1 %vm431_vm2, %v3610_v10  ;;  %4399 = vst [vmem:[#allocation10_spill] sm:$0xff] %v4023_v7  ;;  %v996_v10 = vrot.slane %v3810_v24, 1  ;;  %v998_v45 = vrot.slane %v2608_v36, 1  ;;  %v1192_v7 = vrot.slane %v3751_v32, 1 }
  0x57   : > { %3361 = vmatprep.subr.msk.bf16.mxu1 %vm468_vm0, %v4003_v51  ;;  %3075 = vmatmul.mubr.msk.bf16.gmra.mrb[12].mxu0 %vm431_vm2, %v4008_v20 }
  0x58   : > { %3078 = vmatprep.mubr.msk.bf16.mxu0 %vm431_vm2, %v4014_v11  ;;  %v4036_v6 = vsel %vm772_vm5, %v4028_v54, %v996_v10  ;;  %v4039_v55 = vsel %vm772_vm5, %v996_v10, %v998_v45  ;;  %v1193_v10 = vrot.slane %v3741_v27, 2  ;;  %v1197_v45 = vrot.slane %v3754_v33, 2 }
  0x59   : > { %4400 = vst [vmem:[#allocation11_spill] sm:$0xff] %v4039_v55  ;;  %v1200_v33 = vrot.slane %v3781_v59, 1  ;;  %v2676_v59 = vld [vmem:[%s4375_s2 + $0x10] sm:$0x3] }
  0x5a   : > { %v1198_v55 = vor.u32 %v1197_v45, %v1196_v62  ;;  %v1218_v45 = vshrl.u32 %v2608_v36, 16 }
  0x5d   : > { %2963 = vmatmul.mubr.msk.bf16.gmra.mrb[4].mxu1 %vm431_vm2, %v3624_v17  ;;  %v1444_v17 = vrot.slane %v2608_v36, 2 }
  0x5e   : > { %2966 = vmatprep.mubr.msk.bf16.mxu1 %vm431_vm2, %v3627_v18  ;;  %v1194_v18 = vor.u32 %v1193_v10, %v1192_v7 }
  0x5f   : > { %3079 = vmatmul.mubr.msk.bf16.gmra.mrb[16].mxu0 %vm431_vm2, %v4044_v53  ;;  %v1445_v27 = vsel %vm1420_vm4, %v3847_v19, %v1444_v17  ;;  %v1202_v19 = vor.u32 %v1201_v57, %v1200_v33  ;;  %v1220_v33 = vrot.slane %v1218_v45, 1 }
  0x60   : > { %3082 = vmatprep.mubr.msk.bf16.mxu0 %vm431_vm2, %v4050_v15  ;;  %v4062_v35 = vsel %vm1164_vm3, %v3748_v29, %v1194_v18  ;;  %v4069_v32 = vsel %vm1164_vm3, %v1194_v18, %v1198_v55  ;;  %v1205_v29 = vrot.slane %v3784_v60, 2  ;;  %v2088_v60 = vrot.slane %v3810_v24, 3 }
  0x61   : > { %v4081_v10 = vsel %vm1164_vm3, %v1198_v55, %v1202_v19  ;;  %v4402_v55 = vshll.u32 %v3810_v24, 16  ;;  %v1221_v18 = vshll.u32 %v2608_v36, 16 }
  0x63   : > { %v1214_v62 = vrot.slane %v4402_v55, 2  ;;  %v1223_v57 = vrot.slane %v1221_v18, 2 }
  0x65   : > { %2967 = vmatmul.mubr.msk.bf16.gmra.mrb[8].mxu1 %vm431_vm2, %v3639_v31  ;;  %v1204_v31 = vrot.slane %v3868_v43, 1  ;;  %v1224_v52 = vor.u32 %v1223_v57, %v1220_v33 }
  0x66   : > { %2970 = vmatprep.mubr.msk.bf16.mxu1 %vm431_vm2, %v3656_v41 }
  0x67   : > { %3083 = vmatmul.mubr.msk.bf16.gmra.mrb[20].mxu0 %vm431_vm2, %v1445_v27  ;;  %v1206_v7 = vor.u32 %v1205_v29, %v1204_v31 }
  0x68   : > { %3088 = vmatprep.mubr.msk.bf16.mxu0 %vm431_vm2, %v3787_v61  ;;  %v4401_v61 = vshrl.u32 %v3810_v24, 16 }
  0x69   : > { %v4086_v17 = vsel %vm1164_vm3, %v1202_v19, %v1206_v7  ;;  %v1007_v19 = vsel %vm468_vm0, %v4003_v51, 0  ;;  %v4406_v51 = vld [vmem:[#allocation8_spill] sm:$0xff] }
  0x6a   : > { %v1211_v43 = vrot.slane %v4401_v61, 1 }
  0x6c   : > { %v1215_v27 = vor.u32 %v1214_v62, %v1211_v43 }
  0x6d   : > { %2971 = vmatmul.mubr.msk.bf16.gmra.mrb[12].mxu1 %vm431_vm2, %v3678_v50 }
  0x6e   : > { %2974 = vmatprep.mubr.msk.bf16.mxu1 %vm431_vm2, %v3720_v12  ;;  %v4112_v31 = vsel %vm1164_vm3, %v1206_v7, %v1215_v27  ;;  %v4120_v36 = vsel %vm1164_vm3, %v1215_v27, %v1224_v52  ;;  %v2131_v7 = vsel %vm468_vm0, %v2676_v59, 0 }
  0x6f   : > { %3089 = vmatmul.mubr.msk.bf16.vlgmr.msra.gmra.mrb[0].mxu0 %vm431_vm2, %v3797_v5  ;;  %v4109_v5 = vsel %vm2068_vm7, %v2088_v60, %v2090_v37 }
  0x70   : > { %3113 = vmatpush3.bf16.msra.mxu0 %v1911_v47  ;;  %3092 = vmatprep.mubr.msk.bf16.mxu0 %vm431_vm2, %v3888_v9  ;;  %v2092_v9 = vrot.slane %v3814_v34, 3  ;;  %v792_v47 = vrot.slane %v3745_v28, 1 }
  0x71   : > { %3367 = vmatprep.subr.msk.bf16.mxu0 %vm468_vm0, %v2676_v59  ;;  %v4407_v59 = vld [vmem:[#allocation6_spill] sm:$0xff] }
  0x72   : > { %v4123_v29 = vsel %vm2068_vm7, %v2090_v37, %v2092_v9  ;;  %v796_v61 = vrot.slane %v4407_v59, 1  ;;  %v4278_v37 = vld [vmem:[%s4376_s3] ss:$0 sm:$0xff] }
  0x75   : > { %2975 = vmatmul.mubr.msk.bf16.gmra.mrb[16].mxu1 %vm431_vm2, %v3728_v21 }
  0x76   : > { %2978 = vmatprep.mubr.msk.bf16.mxu1 %vm431_vm2, %v3745_v28 }
  0x77   : > { %3093 = vmatmul.mubr.msk.bf16.gmra.mrb[4].mxu0 %vm431_vm2, %v3907_v22  ;;  %v786_v22 = vrot.slane %v3678_v50, 1 }
  0x78   : > { %3096 = vmatprep.mubr.msk.bf16.mxu0 %vm431_vm2, %v3955_v30  ;;  %v4404_v30 = vld [vmem:[#allocation9_spill] sm:$0xff] }
  0x7d   : > { %2979 = vmatmul.mubr.msk.bf16.gmra.mrb[20].mxu1 %vm431_vm2, %v3760_v38 }
  0x7e   : > { %2984 = vmatprep.mubr.msk.bf16.mxu1 %vm431_vm2, %v3826_v48  ;;  %v4403_v48 = vld [vmem:[#allocation7_spill] sm:$0xff] }
  0x7f   : > { %3097 = vmatmul.mubr.msk.bf16.gmra.mrb[8].mxu0 %vm431_vm2, %v3965_v40 }
  0x80   : > { %3100 = vmatprep.mubr.msk.bf16.mxu0 %vm431_vm2, %v4008_v20  ;;  %v788_v20 = vrot.slane %v3720_v12, 1 }
  0x85   : > { %2985 = vmatmul.mubr.msk.bf16.vlgmr.msra.gmra.mrb[0].mxu1 %vm431_vm2, %v3834_v58 }
  0x86   : > { %3009 = vmatpush3.bf16.msra.mxu1 %v1007_v19  ;;  %2988 = vmatprep.mubr.msk.bf16.mxu1 %vm431_vm2, %v3837_v63 }
  0x87   : > { %3363 = vmatprep.subr.msk.bf16.mxu1 %vm468_vm0, %v3573_v1  ;;  %3101 = vmatmul.mubr.msk.bf16.gmra.mrb[12].mxu0 %vm431_vm2, %v4014_v11  ;;  %v4405_v1 = vrot.slane %v3656_v41, 1  ;;  %v790_v11 = vrot.slane %v3728_v21, 1 }
  0x88   : > { %3104 = vmatprep.mubr.msk.bf16.mxu0 %vm431_vm2, %v4044_v53 }
  0x89   : > { %v787_v40 = vsel %vm772_vm5, %v4405_v1, %v786_v22  ;;  %v791_v53 = vsel %vm772_vm5, %v788_v20, %v790_v11 }
  0x8d   : > { %2989 = vmatmul.mubr.msk.bf16.gmra.mrb[4].mxu1 %vm431_vm2, %v3840_v13 }
  0x8e   : > { %2992 = vmatprep.mubr.msk.bf16.mxu1 %vm431_vm2, %v4403_v48 }
  0x8f   : > { %3105 = vmatmul.mubr.msk.bf16.gmra.mrb[16].mxu0 %vm431_vm2, %v4050_v15  ;;  %v789_v15 = vsel %vm772_vm5, %v786_v22, %v788_v20 }
  0x90   : > { %3108 = vmatprep.mubr.msk.bf16.mxu0 %vm431_vm2, %v4404_v30 }
  0x95   : > { %2993 = vmatmul.mubr.msk.bf16.gmra.mrb[8].mxu1 %vm431_vm2, %v4406_v51 }
  0x96   : > { %2996 = vmatprep.mubr.msk.bf16.mxu1 %vm431_vm2, %v787_v40 }
  0x97   : > { %3109 = vmatmul.mubr.msk.bf16.gmra.mrb[20].mxu0 %vm431_vm2, %v3876_v16  ;;  %v793_v16 = vsel %vm772_vm5, %v790_v11, %v792_v47 }
  0x98   : > { %3114 = vmatprep.mubr.msk.bf16.mxu0 %vm431_vm2, %v3895_v44  ;;  %v795_v44 = vsel %vm772_vm5, %v792_v47, %v4028_v54 }
  0x9d   : > { %2997 = vmatmul.mubr.msk.bf16.gmra.mrb[12].mxu1 %vm431_vm2, %v789_v15 }
  0x9e   : > { %3000 = vmatprep.mubr.msk.bf16.mxu1 %vm431_vm2, %v791_v53 }
  0x9f   : > { %3115 = vmatmul.mubr.msk.bf16.vlgmr.msra.gmra.mrb[0].mxu0 %vm431_vm2, %v3910_v3  ;;  %v797_v3 = vsel %vm772_vm5, %v4028_v54, %v796_v61 }
  0xa0   : > { %3139 = vmatpush3.bf16.msra.mxu0 %v2131_v7  ;;  %3118 = vmatprep.mubr.msk.bf16.mxu0 %vm431_vm2, %v3918_v39  ;;  %v4408_v39 = vld [vmem:[#allocation5_spill] sm:$0xff] }
  0xa5   : > { %3001 = vmatmul.mubr.msk.bf16.gmra.mrb[16].mxu1 %vm431_vm2, %v793_v16 }
  0xa6   : > { %3004 = vmatprep.mubr.msk.bf16.mxu1 %vm431_vm2, %v795_v44 }
  0xa7   : > { %3119 = vmatmul.mubr.msk.bf16.gmra.mrb[4].mxu0 %vm431_vm2, %v3927_v26  ;;  %v1869_v26 = vshll.u32 %v3814_v34, 16 }
  0xa8   : > { %3122 = vmatprep.mubr.msk.bf16.mxu0 %vm431_vm2, %v3936_v25 }
  0xad   : > { %3005 = vmatmul.mubr.msk.bf16.gmra.mrb[20].mxu1 %vm431_vm2, %v797_v3 }
  0xae   : > { %3010 = vmatprep.mubr.msk.bf16.mxu1 %vm431_vm2, %v3834_v58  ;;  %v1866_v58 = vshrl.u32 %v3814_v34, 16 }
  0xaf   : > { %3123 = vmatmul.mubr.msk.bf16.gmra.mrb[8].mxu0 %vm431_vm2, %v3941_v14  ;;  %v2078_v14 = vrot.slane %v3678_v50, 3 }
  0xb0   : > { %3126 = vmatprep.mubr.msk.bf16.mxu0 %vm431_vm2, %v3946_v4  ;;  %v1868_v25 = vrot.slane %v1866_v58, 2  ;;  %v4409_v4 = vrot.slane %v3656_v41, 3 }
  0xb5   : > { %3011 = vmatmul.mubr.msk.bf16.vlgmr.msra.gmra.mrb[0].mxu1 %vm431_vm2, %v3837_v63  ;;  %v1871_v63 = vrot.slane %v1869_v26, 3 }
  0xb6   : > { %3165 = vmatpush3.bf16.msra.mxu1 %v4408_v39  ;;  %3014 = vmatprep.mubr.msk.bf16.mxu1 %vm431_vm2, %v3840_v13 }
  0xb7   : > { %3127 = vmatmul.mubr.msk.bf16.gmra.mrb[12].mxu0 %vm431_vm2, %v3958_v0  ;;  %v1872_v13 = vor.u32 %v1871_v63, %v1868_v25  ;;  %v2079_v0 = vsel %vm2068_vm7, %v4409_v4, %v2078_v14 }
  0xb8   : > { %3130 = vmatprep.mubr.msk.bf16.mxu0 %vm431_vm2, %v3968_v2  ;;  %v4410_v2 = vld [vmem:[#allocation10_spill] sm:$0xff] }
  0xb9   : > { %v1873_v34 = vsel %vm1812_vm6, %v3974_v23, %v1872_v13  ;;  %v2080_v23 = vrot.slane %v3720_v12, 3  ;;  %v2086_v12 = vrot.slane %v3760_v38, 3 }
  0xbb   : > { %v2081_v50 = vsel %vm2068_vm7, %v2078_v14, %v2080_v23 }
  0xbd   : > { %3015 = vmatmul.mubr.msk.bf16.gmra.mrb[4].mxu1 %vm431_vm2, %v4403_v48 }
  0xbe   : > { %3018 = vmatprep.mubr.msk.bf16.mxu1 %vm431_vm2, %v4406_v51 }
  0xbf   : > { %3131 = vmatmul.mubr.msk.bf16.gmra.mrb[16].mxu0 %vm431_vm2, %v3982_v56  ;;  %v4411_v56 = vld [vmem:[#allocation11_spill] sm:$0xff] }
  0xc0   : > { %3134 = vmatprep.mubr.msk.bf16.mxu0 %vm431_vm2, %v3990_v46 }
  0xc5   : > { %3019 = vmatmul.mubr.msk.bf16.gmra.mrb[8].mxu1 %vm431_vm2, %v787_v40 }
  0xc6   : > { %3022 = vmatprep.mubr.msk.bf16.mxu1 %vm431_vm2, %v789_v15 }
  0xc7   : > { %3135 = vmatmul.mubr.msk.bf16.gmra.mrb[20].mxu0 %vm431_vm2, %v1873_v34 }
  0xc8   : > { %3140 = vmatprep.mubr.msk.bf16.mxu0 %vm431_vm2, %v3985_v42  ;;  %v2084_v42 = vrot.slane %v3745_v28, 3  ;;  %v2089_v28 = vsel %vm2068_vm7, %v2086_v12, %v2088_v60 }
  0xca   : > { %v2087_v46 = vsel %vm2068_vm7, %v2084_v42, %v2086_v12 }
  0xcd   : > { %3023 = vmatmul.mubr.msk.bf16.gmra.mrb[12].mxu1 %vm431_vm2, %v791_v53 }
  0xce   : > { %3026 = vmatprep.mubr.msk.bf16.mxu1 %vm431_vm2, %v793_v16 }
  0xcf   : > { %3141 = vmatmul.mubr.msk.bf16.vlgmr.msra.gmra.mrb[0].mxu0 %vm431_vm2, %v3993_v8 }
  0xd0   : > { %3144 = vmatprep.mubr.msk.bf16.mxu0 %vm431_vm2, %v3996_v49  ;;  %v2082_v49 = vrot.slane %v3728_v21, 3 }
  0xd2   : > { %v2083_v41 = vsel %vm2068_vm7, %v2080_v23, %v2082_v49  ;;  %v2085_v21 = vsel %vm2068_vm7, %v2082_v49, %v2084_v42 }
  0xd5   : > { %3027 = vmatmul.mubr.msk.bf16.gmra.mrb[16].mxu1 %vm431_vm2, %v795_v44 }
  0xd6   : > { %3030 = vmatprep.mubr.msk.bf16.mxu1 %vm431_vm2, %v4036_v6 }
  0xd7   : > { %3145 = vmatmul.mubr.msk.bf16.gmra.mrb[4].mxu0 %vm431_vm2, %v4410_v2 }
  0xd8   : > { %3148 = vmatprep.mubr.msk.bf16.mxu0 %vm431_vm2, %v2079_v0 }
  0xdd   : > { %3031 = vmatmul.mubr.msk.bf16.gmra.mrb[20].mxu1 %vm431_vm2, %v4411_v56 }
  0xde   : > { %3048 = vmatprep.mubr.msk.bf16.mxu1 %vm431_vm2, %v4062_v35 }
  0xdf   : > { %3149 = vmatmul.mubr.msk.bf16.gmra.mrb[8].mxu0 %vm431_vm2, %v2081_v50 }
  0xe0   : > { %3152 = vmatprep.mubr.msk.bf16.mxu0 %vm431_vm2, %v2083_v41 }
  0xe5   : > { %3049 = vmatmul.mubr.msk.bf16.vlgmr.msra.gmra.mrb[12].mxu1 %vm431_vm2, %v4069_v32 }
  0xe6   : > { %3052 = vmatprep.mubr.msk.bf16.mxu1 %vm431_vm2, %v4081_v10 }
  0xe7   : > { %3153 = vmatmul.mubr.msk.bf16.gmra.mrb[12].mxu0 %vm431_vm2, %v2085_v21 }
  0xe8   : > { %3156 = vmatprep.mubr.msk.bf16.mxu0 %vm431_vm2, %v2087_v46 }
  0xed   : > { %3053 = vmatmul.mubr.msk.bf16.gmra.mrb[16].mxu1 %vm431_vm2, %v4086_v17 }
  0xee   : > { %3056 = vmatprep.mubr.msk.bf16.mxu1 %vm431_vm2, %v4112_v31 }
  0xef   : > { %3157 = vmatmul.mubr.msk.bf16.gmra.mrb[16].mxu0 %vm431_vm2, %v2089_v28 }
  0xf0   : > { %3160 = vmatprep.mubr.msk.bf16.mxu0 %vm431_vm2, %v4109_v5 }
  0xf5   : > { %3057 = vmatmul.mubr.msk.bf16.gmra.mrb[20].mxu1 %vm431_vm2, %v4120_v36 }
  0xf7   : > { %3161 = vmatmul.mubr.msk.bf16.gmra.mrb[20].mxu0 %vm431_vm2, %v4123_v29 }
 0x188   : > { %v3012_v38 = vpop.f32.mrb[0].mxu1 }
 0x189   : > { %v1043_v8 = vpop.f32.mrb[1].mxu1 }
 0x18a   : > { %v3013_v24 = vpop.f32.mrb[2].mxu1 }
 0x18b   : > { %v1046_v54 = vpop.f32.mrb[3].mxu1 }
 0x190   : > { %v3016_v6 = vpop.f32.mrb[4].mxu1 }
 0x191   : > { %v1059_v35 = vpop.f32.mrb[5].mxu1 }
 0x192   : > { %v3017_v32 = vpop.f32.mrb[6].mxu1 }
 0x193   : > { %v1062_v10 = vpop.f32.mrb[7].mxu1 }
 0x198   : > { %v3020_v17 = vpop.f32.mrb[8].mxu1 }
 0x199   : > { %v1075_v60 = vpop.f32.mrb[9].mxu1 }
 0x19a   : > { %v3021_v43 = vpop.f32.mrb[10].mxu1 }
 0x19b   : > { %v1078_v55 = vpop.f32.mrb[11].mxu1 }
 0x1a2   : > { %v3142_v62 = vpop.f32.mrb[0].mxu0 }
 0x1a3   : > { %v3166_v45 = vadd.f32 %v3142_v62, %v3012_v38  ;;  %v2167_v18 = vpop.f32.mrb[1].mxu0 }
 0x1a4   : > { %v3167_v27 = vadd.f32 %v2167_v18, %v1043_v8  ;;  %v3143_v5 = vpop.f32.mrb[2].mxu0 }
 0x1a5   : > { %v2295_v33 = vadd.f32 %v3166_v45, %v4278_v37  ;;  %v3168_v57 = vadd.f32 %v3143_v5, %v3013_v24  ;;  %v2170_v31 = vpop.f32.mrb[3].mxu0 }
 0x1a6   : > { %v2293_v52 = vadd.f32 %v3167_v27, %v4278_v37  ;;  %v3169_v9 = vadd.f32 %v2170_v31, %v1046_v54 }
 0x1a7   : > { %v2296_v36 = vadd.f32 %v3168_v57, %v4278_v37  ;;  %v2319_v19 = vmax.f32 %v2295_v33, 0.0 }
 0x1a8   : > { %v2294_v29 = vadd.f32 %v3169_v9, %v4278_v37  ;;  %v2317_v22 = vmax.f32 %v2293_v52, 0.0 }
 0x1a9   : > { %v2320_v48 = vmax.f32 %v2296_v36, 0.0 }
 0x1aa   : > { %v2318_v30 = vmax.f32 %v2294_v29, 0.0  ;;  %v3146_v1 = vpop.f32.mrb[4].mxu0 }
 0x1ab   : > { %v2750_v40 = vpack.c.bf16 %v2320_v48, %v2319_v19  ;;  %v3170_v51 = vadd.f32 %v3146_v1, %v3016_v6  ;;  %v2183_v20 = vpop.f32.mrb[5].mxu0 }
 0x1ac   : > { %v2745_v11 = vpack.c.bf16 %v2318_v30, %v2317_v22  ;;  %v3171_v15 = vadd.f32 %v2183_v20, %v1059_v35  ;;  %v3147_v53 = vpop.f32.mrb[6].mxu0 }
 0x1ad   : > { %2802 = vst [vmem:[%s4287_s23 + $0x8] sm:$0xff] %v2750_v40   ;;  %v2299_v7 = vadd.f32 %v3170_v51, %v4278_v37  ;;  %v3172_v47 = vadd.f32 %v3147_v53, %v3017_v32  ;;  %v2186_v16 = vpop.f32.mrb[7].mxu0 }
 0x1ae   : > { %2746 = vst [vmem:[%s4287_s23] sm:$0xff] %v2745_v11   ;;  %v2297_v44 = vadd.f32 %v3171_v15, %v4278_v37  ;;  %v3173_v59 = vadd.f32 %v2186_v16, %v1062_v10 }
 0x1af   : > { %v2300_v61 = vadd.f32 %v3172_v47, %v4278_v37  ;;  %v2323_v39 = vmax.f32 %v2299_v7, 0.0 }
 0x1b0   : > { %v2298_v3 = vadd.f32 %v3173_v59, %v4278_v37  ;;  %v2321_v26 = vmax.f32 %v2297_v44, 0.0 }
 0x1b1   : > { %v2324_v58 = vmax.f32 %v2300_v61, 0.0 }
 0x1b2   : > { %v2322_v25 = vmax.f32 %v2298_v3, 0.0  ;;  %v3150_v63 = vpop.f32.mrb[8].mxu0 }
 0x1b3   : > { %v2760_v13 = vpack.c.bf16 %v2324_v58, %v2323_v39  ;;  %v3174_v34 = vadd.f32 %v3150_v63, %v3020_v17  ;;  %v2199_v14 = vpop.f32.mrb[9].mxu0 }
 0x1b4   : > { %v2755_v4 = vpack.c.bf16 %v2322_v25, %v2321_v26  ;;  %v3175_v0 = vadd.f32 %v2199_v14, %v1075_v60  ;;  %v3151_v2 = vpop.f32.mrb[10].mxu0 }
 0x1b5   : > { %2804 = vst [vmem:[%s4287_s23 + $0x18] sm:$0xff] %v2760_v13   ;;  %v2303_v23 = vadd.f32 %v3174_v34, %v4278_v37  ;;  %v3176_v49 = vadd.f32 %v3151_v2, %v3021_v43  ;;  %v2202_v56 = vpop.f32.mrb[11].mxu0 }
 0x1b6   : > { %2803 = vst [vmem:[%s4287_s23 + $0x10] sm:$0xff] %v2755_v4   ;;  %v2301_v50 = vadd.f32 %v3175_v0, %v4278_v37  ;;  %v3177_v41 = vadd.f32 %v2202_v56, %v1078_v55 }
 0x1b7   : > { %v2304_v42 = vadd.f32 %v3176_v49, %v4278_v37  ;;  %v2327_v28 = vmax.f32 %v2303_v23, 0.0 }
 0x1b8   : > { %v3050_v12 = vpop.f32.mrb[12].mxu1  ;;  %v2302_v21 = vadd.f32 %v3177_v41, %v4278_v37  ;;  %v2325_v24 = vmax.f32 %v2301_v50, 0.0 }
 0x1b9   : > { %v1347_v46 = vpop.f32.mrb[13].mxu1  ;;  %v2328_v38 = vmax.f32 %v2304_v42, 0.0 }
 0x1ba   : > { %v3051_v8 = vpop.f32.mrb[14].mxu1  ;;  %v2326_v54 = vmax.f32 %v2302_v21, 0.0  ;;  %v3154_v6 = vpop.f32.mrb[12].mxu0 }
 0x1bb   : > { %v1350_v35 = vpop.f32.mrb[15].mxu1  ;;  %v2770_v32 = vpack.c.bf16 %v2328_v38, %v2327_v28  ;;  %v3178_v10 = vadd.f32 %v3154_v6, %v3050_v12  ;;  %v2215_v17 = vpop.f32.mrb[13].mxu0 }
 0x1bc   : > { %v2765_v60 = vpack.c.bf16 %v2326_v54, %v2325_v24  ;;  %v3179_v43 = vadd.f32 %v2215_v17, %v1347_v46  ;;  %v3155_v55 = vpop.f32.mrb[14].mxu0 }
 0x1bd   : > { %2806 = vst [vmem:[%s4287_s23 + $0x28] sm:$0xff] %v2770_v32   ;;  %v2307_v62 = vadd.f32 %v3178_v10, %v4278_v37  ;;  %v3180_v45 = vadd.f32 %v3155_v55, %v3051_v8  ;;  %v2218_v18 = vpop.f32.mrb[15].mxu0 }
 0x1be   : > { %2805 = vst [vmem:[%s4287_s23 + $0x20] sm:$0xff] %v2765_v60   ;;  %v2305_v27 = vadd.f32 %v3179_v43, %v4278_v37  ;;  %v3181_v5 = vadd.f32 %v2218_v18, %v1350_v35 }
 0x1bf   : > { %v2308_v33 = vadd.f32 %v3180_v45, %v4278_v37  ;;  %v2331_v9 = vmax.f32 %v2307_v62, 0.0 }
 0x1c0   : > { %v3054_v57 = vpop.f32.mrb[16].mxu1  ;;  %v2306_v31 = vadd.f32 %v3181_v5, %v4278_v37  ;;  %v2329_v19 = vmax.f32 %v2305_v27, 0.0 }
 0x1c1   : > { %v1363_v52 = vpop.f32.mrb[17].mxu1  ;;  %v2332_v36 = vmax.f32 %v2308_v33, 0.0 }
 0x1c2   : > { %v3055_v29 = vpop.f32.mrb[18].mxu1  ;;  %v2330_v48 = vmax.f32 %v2306_v31, 0.0  ;;  %v3158_v22 = vpop.f32.mrb[16].mxu0 }
 0x1c3   : > { %v1366_v30 = vpop.f32.mrb[19].mxu1  ;;  %v2780_v1 = vpack.c.bf16 %v2332_v36, %v2331_v9  ;;  %v3182_v40 = vadd.f32 %v3158_v22, %v3054_v57  ;;  %v2231_v51 = vpop.f32.mrb[17].mxu0 }
 0x1c4   : > { %v2775_v20 = vpack.c.bf16 %v2330_v48, %v2329_v19  ;;  %v3183_v11 = vadd.f32 %v2231_v51, %v1363_v52  ;;  %v3159_v15 = vpop.f32.mrb[18].mxu0 }
 0x1c5   : > { %2808 = vst [vmem:[%s4287_s23 + $0x38] sm:$0xff] %v2780_v1   ;;  %v2311_v53 = vadd.f32 %v3182_v40, %v4278_v37  ;;  %v3184_v7 = vadd.f32 %v3159_v15, %v3055_v29  ;;  %v2234_v47 = vpop.f32.mrb[19].mxu0 }
 0x1c6   : > { %2807 = vst [vmem:[%s4287_s23 + $0x30] sm:$0xff] %v2775_v20   ;;  %v2309_v16 = vadd.f32 %v3183_v11, %v4278_v37  ;;  %v3185_v44 = vadd.f32 %v2234_v47, %v1366_v30 }
 0x1c7   : > { %v2312_v59 = vadd.f32 %v3184_v7, %v4278_v37  ;;  %v2335_v58 = vmax.f32 %v2311_v53, 0.0 }
 0x1c8   : > { %v3058_v61 = vpop.f32.mrb[20].mxu1  ;;  %v2310_v3 = vadd.f32 %v3185_v44, %v4278_v37  ;;  %v2333_v63 = vmax.f32 %v2309_v16, 0.0 }
 0x1c9   : > { %v1379_v39 = vpop.f32.mrb[21].mxu1  ;;  %v2336_v26 = vmax.f32 %v2312_v59, 0.0 }
 0x1ca   : > { %v3059_v25 = vpop.f32.mrb[22].mxu1  ;;  %v2334_v13 = vmax.f32 %v2310_v3, 0.0  ;;  %v3162_v34 = vpop.f32.mrb[20].mxu0 }
 0x1cb   : > { %v1382_v14 = vpop.f32.mrb[23].mxu1  ;;  %v2790_v4 = vpack.c.bf16 %v2336_v26, %v2335_v58  ;;  %v3186_v0 = vadd.f32 %v3162_v34, %v3058_v61  ;;  %v2247_v2 = vpop.f32.mrb[21].mxu0 }
 0x1cc   : > { %v2785_v23 = vpack.c.bf16 %v2334_v13, %v2333_v63  ;;  %v3187_v49 = vadd.f32 %v2247_v2, %v1379_v39  ;;  %v3163_v56 = vpop.f32.mrb[22].mxu0 }
 0x1cd   : > { %2810 = vst [vmem:[%s4287_s23 + $0x48] sm:$0xff] %v2790_v4   ;;  %v2315_v50 = vadd.f32 %v3186_v0, %v4278_v37  ;;  %v3188_v41 = vadd.f32 %v3163_v56, %v3059_v25  ;;  %v2250_v42 = vpop.f32.mrb[23].mxu0 }
 0x1ce   : > { %2809 = vst [vmem:[%s4287_s23 + $0x40] sm:$0xff] %v2785_v23   ;;  %v2313_v12 = vadd.f32 %v3187_v49, %v4278_v37  ;;  %v3189_v21 = vadd.f32 %v2250_v42, %v1382_v14 }
 0x1cf   : > { %v2316_v46 = vadd.f32 %v3188_v41, %v4278_v37  ;;  %v2339_v38 = vmax.f32 %v2315_v50, 0.0 }
 0x1d0   : > { %v2314_v28 = vadd.f32 %v3189_v21, %v4278_v37  ;;  %v2337_v24 = vmax.f32 %v2313_v12, 0.0 }
 0x1d1   : > { %v2340_v8 = vmax.f32 %v2316_v46, 0.0 }
 0x1d2   : > { %v2338_v54 = vmax.f32 %v2314_v28, 0.0 }
 0x1d3   : > { %v2800_v6 = vpack.c.bf16 %v2340_v8, %v2339_v38 }
 0x1d4   : > { %v2795_v35 = vpack.c.bf16 %v2338_v54, %v2337_v24 }
 0x1d5   : > { %2812 = vst [vmem:[%s4287_s23 + $0x58] sm:$0xff] %v2800_v6  }
 0x1d6   : > { %2811 = vst [vmem:[%s4287_s23 + $0x50] sm:$0xff] %v2795_v35  }
 0x1d7   : > { %3440 = shalt.err (!%p3437_p4)
}
 0x1d8   : > { %s3441_s10 = scalar_lea.hbm %s4324_s5, 1536  ;;  %s3445_s13 = scalar_lea.hbm %s4377_s4, 6144 }
 0x1d9   : > { %p3442_p7 = scmp.ne.s32.totalorder %s4324_s5, %s3441_s10  ;;  %p3446_p10 = scmp.lt.u32.totalorder %s4324_s5, %s4377_s4 }
 0x1da   : > { %p3447_p11 = scmp.lt.u32.totalorder %s3445_s13, %s3441_s10  ;;  %p3449_p13 = scmp.lt.u32.totalorder %s3441_s10, %s4324_s5 }
 0x1db   : > { %p3443_p8 = pnand %p3442_p7, %p3557_p5 }
 0x1dc   : > { %p3448_p12 = por %p3447_p11, %p3446_p10 }
 0x1dd   : > { %p3444_p9 = pneg %p3443_p8 }
 0x1de   : > { %p3450_p0 = por %p3449_p13, %p3448_p12 }
 0x1e0   : > { %p3451_p1 = pnand %p3450_p0, %p3444_p9 }
 0x1e2   : > { %3454 = shalt.err (!%p3451_p1)
}
 0x1e3   : > { %s3492_s22 = smov 64   ;;  %s3493_s23 = smov 4  }
 0x1e4   : > { %3369 = dma.vmem_to_hbm [thread:$0]  (%p3557_p5), %s4326_s28, 1536, %s4324_s5, %s4332_s19, %s3492_s22, %s3492_s22, %s3493_s23  }
 0x1e5 PF: > { %p3375_p2 = scmp.ge.s32.totalorder %s3489_s18, 2  ;;  %s2490_s27 = sand.u32 1, %s3477_s15  }
 0x1e6   : > { %s2491_s29 = scalar_lea.sflag [#allocation3], %s2490_s27 }
 0x1e7   : > { %p3372_p3 = pnand %p3375_p2, %p3561_p6 }
 0x1e9   : > { %3472 = dma.done.wait (!%p3372_p3), %s2491_s29, 1536  }
 0x1ea   : > { %3474 = vsyncadd (!%p3372_p3), %s2491_s29, 4294965760  ;;  %p14_p4 = scmp.ge.s32.totalorder %s3544_s21, 6   ;;  %s4412_s15 = smov %s3481_s16 }
 0x1eb   : > { %s4413_s16 = smov %s3485_s17  ;;  %s4414_s17 = smov %s3555_s24 }
 0x1ec   : > { %s4415_s18 = smov %s3544_s21  ;;  %16 = sbr.rel (!%p14_p4) target bundleno = 3 (0x3), region = 82 }
 0x1f3   :  { %2496 = vsyncpa [#allocation3], 1 }
 0x1f4   :  { %2498 = vsyncpa [#allocation3 + $0x1], 1 }

</bundles_post_ra>
